<compile_context>
chip_gen: v7x
topology: tpu7x:2x2x1
jax: 0.10.0
libtpu: 0.0.40
codegen_flags: <defaults>
</compile_context>

<pallas_src>
import functools

import jax
import jax.numpy as jnp
from jax import lax
from jax.experimental import pallas as pl
from jax.experimental.pallas import tpu as pltpu


def _copy_kernel(x_ref, o_ref):
    # Identity copy of one lane-dense block of the flattened element stream.
    o_ref[...] = x_ref[...]


def _resolve_size(total, size):
    """Replicate torch.Tensor.view size resolution (supports a single -1)."""
    size = list(size)
    neg = [i for i, s in enumerate(size) if s == -1]
    if len(neg) > 1:
        raise ValueError("only one dimension can be inferred")
    if neg:
        known = 1
        for i, s in enumerate(size):
            if i != neg[0]:
                known *= s
        if known == 0 or total % known != 0:
            raise ValueError(f"shape {size} is invalid for input of size {total}")
        size[neg[0]] = total // known
    prod = 1
    for s in size:
        prod *= s
    if prod != total:
        raise ValueError(f"shape {size} is invalid for input of size {total}")
    return tuple(size)


def _round_up(a, b):
    return ((a + b - 1) // b) * b


def _block_budget():
    """Return (block_bytes, vmem_limit_bytes), generation aware.

    4 x block_bytes (input + output, each double-buffered) must fit the scoped
    VMEM limit with headroom for compiler-internal scratch.
    """
    try:
        vmem_cap = int(pltpu.get_tpu_info().vmem_capacity_bytes)
    except Exception:
        vmem_cap = 64 * 1024 * 1024  # conservative (v7x-sized) default
    block_bytes = max(2 * 1024 * 1024, min(16 * 1024 * 1024, vmem_cap // 8))
    vmem_limit = min(5 * block_bytes, (vmem_cap * 3) // 4)
    return block_bytes, vmem_limit


def _streaming_copy(slab, *, block_bytes, vmem_limit):
    """Identity-copy a (rows, lanes) word slab through a pipelined Pallas kernel."""
    rows, lanes = slab.shape
    word_size = jnp.dtype(slab.dtype).itemsize
    sub_mult = {4: 8, 2: 16, 1: 32}[word_size]

    block_rows = max(sub_mult, block_bytes // (lanes * word_size))
    if rows <= block_rows:
        # Single block equal to the full array extent (always a legal tiling).
        block_rows = rows
    else:
        block_rows = (block_rows // sub_mult) * sub_mult
    grid = (pl.cdiv(rows, block_rows),)

    spec = pl.BlockSpec((block_rows, lanes), lambda i: (i, 0))
    return pl.pallas_call(
        _copy_kernel,
        out_shape=jax.ShapeDtypeStruct((rows, lanes), slab.dtype),
        grid_spec=pltpu.PrefetchScalarGridSpec(
            num_scalar_prefetch=0,
            grid=grid,
            in_specs=[spec],
            out_specs=spec,
        ),
        compiler_params=pltpu.CompilerParams(
            dimension_semantics=("parallel",),
            vmem_limit_bytes=vmem_limit,
        ),
        cost_estimate=pl.CostEstimate(
            flops=0,
            transcendentals=0,
            bytes_accessed=2 * rows * lanes * word_size,
        ),
    )(slab)


@functools.partial(jax.jit, static_argnums=(1,))
def _view_pallas_impl(x, size):
    total = x.size
    out_shape = _resolve_size(total, size)
    if total == 0:
        return jnp.reshape(x, out_shape)

    dtype = x.dtype
    itemsize = jnp.dtype(dtype).itemsize
    flat = jnp.reshape(x, (total,))

    # View the element stream as fully packed 32-bit words whenever possible so
    # the f32/uint32 (8, 128) tiling applies regardless of the input dtype.
    if dtype == jnp.bool_:
        # TODO(synk): bitcast from bool is ill-defined; copy the 0/1 byte stream.
        words = flat.astype(jnp.uint8)
        unpack = lambda w: w.astype(jnp.bool_)
    elif itemsize == 8:
        words = lax.bitcast_convert_type(flat, jnp.uint32).reshape(-1)
        unpack = lambda w: lax.bitcast_convert_type(w.reshape(total, 2), dtype)
    elif itemsize < 4 and total % (4 // itemsize) == 0:
        pack = 4 // itemsize
        words = lax.bitcast_convert_type(
            flat.reshape(total // pack, pack), jnp.uint32)
        unpack = lambda w: lax.bitcast_convert_type(w, dtype).reshape(-1)
    else:
        words = flat
        unpack = lambda w: w

    n_words = words.shape[0]
    block_bytes, vmem_limit = _block_budget()

    # Widest lane-dense layout that divides the stream exactly -> the slab is a
    # pure metadata reshape: no jnp.pad before, no tail slice after the kernel.
    lanes = next((c for c in (512, 256, 128) if n_words % c == 0), None)

    if lanes is not None:
        slab = words.reshape(n_words // lanes, lanes)
        copied = _streaming_copy(slab, block_bytes=block_bytes,
                                 vmem_limit=vmem_limit)
        out_words = copied.reshape(n_words)
    else:
        # Ragged stream (length not a multiple of 128 words): pad only the last
        # partial lane row, copy, then drop the pad words.
        lanes = 128
        padded = _round_up(n_words, lanes)
        slab = jnp.pad(words, (0, padded - n_words)).reshape(
            padded // lanes, lanes)
        copied = _streaming_copy(slab, block_bytes=block_bytes,
                                 vmem_limit=vmem_limit)
        out_words = copied.reshape(padded)[:n_words]

    return jnp.reshape(unpack(out_words), out_shape)


def view_pallas(x, size):
    """Pallas-backed equivalent of `tensor.view(size)`."""
    if isinstance(size, (list, tuple)):
        size = tuple(int(s) for s in size)
    else:
        size = (int(size),)
    return _view_pallas_impl(x, size)


class View:
    """JAX/Pallas mirror of the PyTorch View module."""

    def __init__(self, size):
        self.size = size

    def __call__(self, tensor):
        return view_pallas(tensor, self.size)


if __name__ == "__main__":
    key = jax.random.PRNGKey(0)

    # WAE-style flatten: (B, C, H, W) -> (B, C*H*W)
    x = jax.random.normal(key, (2, 4, 16, 16), dtype=jnp.float32)
    mod = View((-1, 4 * 16 * 16))
    y = jax.block_until_ready(mod(x))
    ref = jnp.reshape(x, (2, 4 * 16 * 16))
    assert y.shape == (2, 1024) and y.dtype == x.dtype
    assert bool(jnp.all(y == ref))

    # bf16 path (exercises the uint32 packing branch).
    xb = x.astype(jnp.bfloat16)
    yb = jax.block_until_ready(View((2, -1))(xb))
    assert yb.shape == (2, 1024) and yb.dtype == jnp.bfloat16
    assert bool(jnp.all(yb == jnp.reshape(xb, (2, 1024))))

    # Ragged size (not a multiple of 128 words) exercises the padded fallback.
    xr = jax.random.normal(key, (3, 5, 7), dtype=jnp.float32)
    yr = jax.block_until_ready(View((-1,))(xr))
    assert yr.shape == (105,)
    assert bool(jnp.all(yr == jnp.reshape(xr, (105,))))

    # Multi-block grid with a masked ragged edge block (no pad on this path).
    xm = jax.random.normal(key, (10, 1000, 512), dtype=jnp.float32)
    ym = jax.block_until_ready(View((10, -1))(xm))
    assert ym.shape == (10, 512000)
    assert bool(jnp.all(ym == jnp.reshape(xm, (10, 512000))))

    print("KERNEL_OK")
</pallas_src>

<mosaic_0001>
module attributes {stable_mosaic.version = 11 : i64} {
  func.func @_copy_kernel(%arg0: i32, %arg1: memref<4x512xf32, #tpu.memory_space<vmem>>, %arg2: memref<4x512xf32, #tpu.memory_space<vmem>>) attributes {dimension_semantics = [#tpu.dimension_semantics<parallel>], iteration_bounds = array<i64: 1>, scalar_prefetch = 0 : i64, scratch_operands = 0 : i64, tpu.core_type = #tpu.core_type<tc>, window_params = [{transform_indices = @transform_0, window_bounds = array<i64: 4, 512>}, {transform_indices = @transform_1, window_bounds = array<i64: 4, 512>}]} {
    %c0 = arith.constant 0 : index
    %c0_0 = arith.constant 0 : index
    %0 = vector.load %arg1[%c0, %c0_0] : memref<4x512xf32, #tpu.memory_space<vmem>>, vector<4x512xf32>
    %c0_1 = arith.constant 0 : index
    %c0_2 = arith.constant 0 : index
    %1 = vector.load %arg2[%c0_1, %c0_2] : memref<4x512xf32, #tpu.memory_space<vmem>>, vector<4x512xf32>
    tpu.vector_store %arg2[%c0_1, %c0_2], %0 {strides = array<i32>} : memref<4x512xf32, #tpu.memory_space<vmem>>, vector<4x512xf32>,
    return
  }
  func.func @transform_0(%arg0: i32) -> (i32, i32) {
    %c0_i32 = arith.constant 0 : i32
    %c0_i32_0 = arith.constant 0 : i32
    return %arg0, %c0_i32 : i32, i32
  }
  func.func @transform_1(%arg0: i32) -> (i32, i32) {
    %c0_i32 = arith.constant 0 : i32
    %c0_i32_0 = arith.constant 0 : i32
    return %arg0, %c0_i32 : i32, i32
  }
}

</mosaic_0001>

<bundles_post_ra>
// kernel: _view_pallas_impl.1
= control target key start
LH: loop header
LB: loop body
LE: loop exit
PB: predicated region body
PF: predicated region fallthrough
CT: control target
= control target key end

     0   :  { %s38_s0 = inlined_call_operand.vmem [shape: f32[4,512], index: 0, kind: input, shape index: {}]   ;;  %s39_s1 = inlined_call_operand.vmem [shape: f32[4,512], index: 1, kind: output, shape index: {}]  }
   0x1   :  { %v8_v0 = vld [vmem:[%s38_s0] sm:$0xff]  ;;  %v9_v1 = vld [vmem:[%s38_s0 + $0x8] sm:$0xff] }
   0x2   :  { %10 = vst [vmem:[%s39_s1] sm:$0xff] %v8_v0  ;;  %11 = vst [vmem:[%s39_s1 + $0x8] sm:$0xff] %v9_v1 }

</bundles_post_ra>
